<compile_context>
chip_gen: v6e
topology: v6e:2x2x1
jax: 0.10.0
libtpu: 0.0.40
codegen_flags: <defaults>
</compile_context>

<pallas_src>
import functools

import jax
import jax.numpy as jnp
from jax.experimental import pallas as pl
from jax.experimental.pallas import tpu as pltpu


def _round_up(x, m):
    return (x + m - 1) // m * m


def _vmem_limit_bytes():
    """Per-generation scoped-VMEM budget: 3/4 of physical VMEM
    (v5e/v6e 128 MiB -> 96 MiB, v7x 64 MiB -> 48 MiB), 64 MiB fallback."""
    cap = 64 * 1024 * 1024
    try:
        cap = int(pltpu.get_tpu_info().vmem_capacity_bytes)
    except Exception:
        pass
    return max(32 * 1024 * 1024, (cap * 3) // 4)


def _encoder_wrapper_kernel(x_ref, wenc_ref, wro_ref, bro_ref, out_ref, acc_ref):
    # grid = (batch_tile i, k_tile k); batch is "parallel", k is the "arbitrary" reduction.
    # x_ref:    (tb, tk)            bf16 flattened-image tile
    # wenc_ref: (tk, F_pad)         bf16 synthetic encoder projection tile
    # wro_ref:  (F_pad, O_pad)      f32 readout weight (pre-transposed), resident
    # bro_ref:  (1, O_pad)          f32 readout bias, resident
    # out_ref:  (tb, O_pad)         f32 output tile (resident across k)
    # acc_ref:  (tb, F_pad)         f32 accumulator scratch
    k = pl.program_id(1)

    @pl.when(k == 0)
    def _():
        acc_ref[...] = jnp.zeros_like(acc_ref)

    # encoder matmul: bf16 inputs, f32 accumulation on the MXU
    acc_ref[...] += jnp.dot(x_ref[...], wenc_ref[...],
                            preferred_element_type=jnp.float32)

    @pl.when(k == pl.num_programs(1) - 1)
    def _():
        feats = acc_ref[...]                                        # (tb, F_pad) f32
        # --- L2 normalize along last dim: x / x.norm(dim=-1, keepdim=True) (no eps, as in spec) ---
        sq_sum = jnp.sum(feats * feats, axis=-1, keepdims=True)     # XLU reduce
        inv_norm = jax.lax.rsqrt(sq_sum)                            # EUP
        feats = feats * inv_norm
        # --- linear readout: feats @ W_ro^T + b (weight already stored as (F, O)) ---
        out = jnp.dot(feats, wro_ref[...], preferred_element_type=jnp.float32)
        out = out + bro_ref[...]
        out_ref[...] = out.astype(out_ref.dtype)


@functools.partial(jax.jit, static_argnames=("tb", "tk"))
def image_encoder_wrapper_forward(x_nchw, w_enc, w_ro_t, b_ro, *, tb=None, tk=None):
    """x_nchw: (B, 3, H, W) images.
    w_enc:  (D_in, F) synthetic linear encoder weight.
    w_ro_t: (F, O) readout weight stored pre-transposed (nn.Linear weight is (O, F)).
    b_ro:   (O,) readout bias.
    Returns (B, O) float32."""
    B = x_nchw.shape[0]
    d_in = x_nchw.shape[1] * x_nchw.shape[2] * x_nchw.shape[3]
    feat_dim, out_dim = w_ro_t.shape
    assert w_enc.shape == (d_in, feat_dim)

    vmem_limit = _vmem_limit_bytes()

    # lane/sublane-dense padded dims
    B_pad = _round_up(B, 8)
    feat_pad = _round_up(feat_dim, 128)
    out_pad = _round_up(out_dim, 128)

    # ---- tile selection ----
    if tb is None:
        tb = min(B_pad, 256)
    B_pad = _round_up(B_pad, tb)
    if tk is None:
        # VMEM resident pieces: readout weight+bias (double-buffered by pallas), accumulator,
        # output tile (double-buffered).
        fixed = (feat_pad * out_pad * 4 * 2 + out_pad * 4 * 2
                 + tb * feat_pad * 4 + tb * out_pad * 4 * 2)
        budget = max(vmem_limit - fixed - (8 << 20), vmem_limit // 4)
        # streamed: x tile (2 bufs x tb x tk x 2B) + w_enc tile (2 bufs x tk x F_pad x 2B)
        tk = budget // (4 * (tb + feat_pad))
        tk = max(128, (tk // 128) * 128)
    tk = min(tk, _round_up(d_in, 128))
    d_in_pad = _round_up(d_in, tk)

    # ---- glue: flatten / pad / cast (streamed operands in bf16 halve HBM traffic) ----
    x_flat = x_nchw.reshape(B, d_in)
    x_p = jnp.pad(x_flat.astype(jnp.bfloat16),
                  ((0, B_pad - B), (0, d_in_pad - d_in)))
    w_enc_p = jnp.pad(w_enc.astype(jnp.bfloat16),
                      ((0, d_in_pad - d_in), (0, feat_pad - feat_dim)))
    w_ro_p = jnp.pad(w_ro_t.astype(jnp.float32),
                     ((0, feat_pad - feat_dim), (0, out_pad - out_dim)))
    b_ro_p = jnp.pad(b_ro.astype(jnp.float32), (0, out_pad - out_dim)).reshape(1, out_pad)

    grid = (B_pad // tb, d_in_pad // tk)

    cost = pl.CostEstimate(
        flops=2 * B_pad * d_in_pad * feat_pad + 2 * B_pad * feat_pad * out_pad,
        transcendentals=B_pad,
        bytes_accessed=(x_p.size * 2 + w_enc_p.size * 2
                        + w_ro_p.size * 4 + b_ro_p.size * 4 + B_pad * out_pad * 4),
    )

    out_padded = pl.pallas_call(
        _encoder_wrapper_kernel,
        out_shape=jax.ShapeDtypeStruct((B_pad, out_pad), jnp.float32),
        grid_spec=pltpu.PrefetchScalarGridSpec(
            num_scalar_prefetch=0,
            grid=grid,
            in_specs=[
                pl.BlockSpec((tb, tk), lambda i, k: (i, k)),             # x tile
                pl.BlockSpec((tk, feat_pad), lambda i, k: (k, 0)),       # w_enc tile
                pl.BlockSpec((feat_pad, out_pad), lambda i, k: (0, 0)),  # w_ro (pre-transposed)
                pl.BlockSpec((1, out_pad), lambda i, k: (0, 0)),         # bias
            ],
            out_specs=pl.BlockSpec((tb, out_pad), lambda i, k: (i, 0)),
            scratch_shapes=[pltpu.VMEM((tb, feat_pad), jnp.float32)],    # feats accumulator
        ),
        compiler_params=pltpu.CompilerParams(
            dimension_semantics=("parallel", "arbitrary"),
            vmem_limit_bytes=vmem_limit,
        ),
        cost_estimate=cost,
    )(x_p, w_enc_p, w_ro_p, b_ro_p)

    # slice off lane/sublane padding
    return out_padded[:B, :out_dim]


def _reference_forward(x_nchw, w_enc, w_ro_t, b_ro):
    B = x_nchw.shape[0]
    x_flat = x_nchw.reshape(B, -1).astype(jnp.float32)
    feats = x_flat @ w_enc.astype(jnp.float32)
    feats = feats / jnp.linalg.norm(feats, axis=-1, keepdims=True)
    return feats @ w_ro_t.astype(jnp.float32) + b_ro


if __name__ == "__main__":
    # Small shapes consistent with the module's forward:
    #   batch=2, channels=3 (RGB), image_size=16, encoder feature size=32, output_size=8
    B, C, H, W = 2, 3, 16, 16
    FEAT, OUT = 32, 8
    D_IN = C * H * W  # 768

    key = jax.random.PRNGKey(0)
    k_x, k_enc, k_w, k_b = jax.random.split(key, 4)

    x = jax.random.normal(k_x, (B, C, H, W), dtype=jnp.float32)
    w_enc = jax.random.normal(k_enc, (D_IN, FEAT), dtype=jnp.float32) * 0.02
    # readout weight stored pre-transposed as (F, O) so no per-call transpose
    w_ro_t = jax.random.normal(k_w, (FEAT, OUT), dtype=jnp.float32) * (1.0 / jnp.sqrt(FEAT))
    b_ro = jax.random.normal(k_b, (OUT,), dtype=jnp.float32) * 0.01

    # small explicit tk exercises the k-reduction grid + accumulator path (768 / 256 = 3 k-tiles)
    out = image_encoder_wrapper_forward(x, w_enc, w_ro_t, b_ro, tb=8, tk=256)
    out = jax.block_until_ready(out)

    ref = _reference_forward(x, w_enc, w_ro_t, b_ro)
    assert out.shape == (B, OUT), out.shape
    # bf16 is used for the streamed encoder matmul, so compare with a bf16-level tolerance
    assert jnp.allclose(out, ref, atol=1e-2, rtol=1e-2), (out, ref)

    # also exercise the auto tile-size path (single k tile, whole D_in resident)
    out_auto = jax.block_until_ready(image_encoder_wrapper_forward(x, w_enc, w_ro_t, b_ro))
    assert jnp.allclose(out_auto, ref, atol=1e-2, rtol=1e-2), (out_auto, ref)

    print("KERNEL_OK")
</pallas_src>

<mosaic_0001>
module attributes {stable_mosaic.version = 11 : i64} {
  func.func @_encoder_wrapper_kernel(%arg0: i32, %arg1: i32, %arg2: memref<8x256xbf16, #tpu.memory_space<vmem>>, %arg3: memref<256x128xbf16, #tpu.memory_space<vmem>>, %arg4: memref<128x128xf32, #tpu.memory_space<vmem>>, %arg5: memref<1x128xf32, #tpu.memory_space<vmem>>, %arg6: memref<8x128xf32, #tpu.memory_space<vmem>>, %arg7: memref<8x128xf32, #tpu.memory_space<vmem>>) attributes {dimension_semantics = [#tpu.dimension_semantics<parallel>, #tpu.dimension_semantics<arbitrary>], iteration_bounds = array<i64: 1, 3>, scalar_prefetch = 0 : i64, scratch_operands = 1 : i64, tpu.core_type = #tpu.core_type<tc>, window_params = [{transform_indices = @transform_0, window_bounds = array<i64: 8, 256>}, {transform_indices = @transform_1, window_bounds = array<i64: 256, 128>}, {pipeline_mode = #tpu.pipeline_mode<synchronous>, transform_indices = @transform_2, window_bounds = array<i64: 128, 128>}, {pipeline_mode = #tpu.pipeline_mode<synchronous>, transform_indices = @transform_3, window_bounds = array<i64: 1, 128>}, {transform_indices = @transform_4, window_bounds = array<i64: 8, 128>}]} {
    %c0_i32 = arith.constant 0 : i32
    %0 = arith.cmpi eq, %arg1, %c0_i32 : i32
    %1 = arith.extui %0 : i1 to i32
    %c0_i32_0 = arith.constant 0 : i32
    %2 = arith.cmpi ne, %1, %c0_i32_0 : i32
    scf.if %2 {
      %cst_9 = arith.constant 0.000000e+00 : f32
      %12 = vector.broadcast %cst_9 : f32 to vector<8x128xf32>
      %c0_10 = arith.constant 0 : index
      %c0_11 = arith.constant 0 : index
      %13 = vector.load %arg7[%c0_10, %c0_11] : memref<8x128xf32, #tpu.memory_space<vmem>>, vector<8x128xf32>
      tpu.vector_store %arg7[%c0_10, %c0_11], %12 {strides = array<i32>} : memref<8x128xf32, #tpu.memory_space<vmem>>, vector<8x128xf32>,
    } else {
    }
    %c0 = arith.constant 0 : index
    %c0_1 = arith.constant 0 : index
    %3 = vector.load %arg7[%c0, %c0_1] : memref<8x128xf32, #tpu.memory_space<vmem>>, vector<8x128xf32>
    %c0_2 = arith.constant 0 : index
    %c0_3 = arith.constant 0 : index
    %4 = vector.load %arg2[%c0_2, %c0_3] : memref<8x256xbf16, #tpu.memory_space<vmem>>, vector<8x256xbf16>
    %c0_4 = arith.constant 0 : index
    %c0_5 = arith.constant 0 : index
    %5 = vector.load %arg3[%c0_4, %c0_5] : memref<256x128xbf16, #tpu.memory_space<vmem>>, vector<256x128xbf16>
    %cst = arith.constant dense<0.000000e+00> : vector<8x128xf32>
    %6 = tpu.matmul %4, %5, %cst {dimension_numbers = #tpu.dot_dimension_numbers<[1], [0], [0], [1], [0, 0, 1, 1], [], []>} : vector<8x256xbf16>, vector<256x128xbf16>, vector<8x128xf32> -> vector<8x128xf32>
    %7 = arith.addf %3, %6 : vector<8x128xf32>
    %c0_6 = arith.constant 0 : index
    %c0_7 = arith.constant 0 : index
    %8 = vector.load %arg7[%c0_6, %c0_7] : memref<8x128xf32, #tpu.memory_space<vmem>>, vector<8x128xf32>
    tpu.vector_store %arg7[%c0_6, %c0_7], %7 {strides = array<i32>} : memref<8x128xf32, #tpu.memory_space<vmem>>, vector<8x128xf32>,
    %c2_i32 = arith.constant 2 : i32
    %9 = arith.cmpi eq, %arg1, %c2_i32 : i32
    %10 = arith.extui %9 : i1 to i32
    %c0_i32_8 = arith.constant 0 : i32
    %11 = arith.cmpi ne, %10, %c0_i32_8 : i32
    scf.if %11 {
      %c0_9 = arith.constant 0 : index
      %c0_10 = arith.constant 0 : index
      %12 = vector.load %arg7[%c0_9, %c0_10] : memref<8x128xf32, #tpu.memory_space<vmem>>, vector<8x128xf32>
      %13 = arith.mulf %12, %12 : vector<8x128xf32>
      %cst_11 = arith.constant dense<0.000000e+00> : vector<8xf32>
      %14 = vector.multi_reduction <add>, %13, %cst_11 [1] : vector<8x128xf32> to vector<8xf32>
      %15 = vector.shape_cast %14 : vector<8xf32> to vector<8x1xf32>
      %16 = math.rsqrt %15 : vector<8x1xf32>
      %17 = vector.broadcast %16 : vector<8x1xf32> to vector<8x128xf32>
      %18 = arith.mulf %12, %17 : vector<8x128xf32>
      %c0_12 = arith.constant 0 : index
      %c0_13 = arith.constant 0 : index
      %19 = vector.load %arg4[%c0_12, %c0_13] : memref<128x128xf32, #tpu.memory_space<vmem>>, vector<128x128xf32>
      %cst_14 = arith.constant dense<0.000000e+00> : vector<8x128xf32>
      %20 = tpu.matmul %18, %19, %cst_14 {dimension_numbers = #tpu.dot_dimension_numbers<[1], [0], [0], [1], [0, 0, 1, 1], [], []>} : vector<8x128xf32>, vector<128x128xf32>, vector<8x128xf32> -> vector<8x128xf32>
      %c0_15 = arith.constant 0 : index
      %c0_16 = arith.constant 0 : index
      %21 = vector.load %arg5[%c0_15, %c0_16] : memref<1x128xf32, #tpu.memory_space<vmem>>, vector<1x128xf32>
      %22 = vector.broadcast %21 : vector<1x128xf32> to vector<8x128xf32>
      %23 = arith.addf %20, %22 : vector<8x128xf32>
      %c0_17 = arith.constant 0 : index
      %c0_18 = arith.constant 0 : index
      %24 = vector.load %arg6[%c0_17, %c0_18] : memref<8x128xf32, #tpu.memory_space<vmem>>, vector<8x128xf32>
      tpu.vector_store %arg6[%c0_17, %c0_18], %23 {strides = array<i32>} : memref<8x128xf32, #tpu.memory_space<vmem>>, vector<8x128xf32>,
    } else {
    }
    return
  }
  func.func @transform_0(%arg0: i32, %arg1: i32) -> (i32, i32) {
    %c0_i32 = arith.constant 0 : i32
    return %arg0, %arg1 : i32, i32
  }
  func.func @transform_1(%arg0: i32, %arg1: i32) -> (i32, i32) {
    %c0_i32 = arith.constant 0 : i32
    %c0_i32_0 = arith.constant 0 : i32
    return %arg1, %c0_i32 : i32, i32
  }
  func.func @transform_2(%arg0: i32, %arg1: i32) -> (i32, i32) {
    %c0_i32 = arith.constant 0 : i32
    %c0_i32_0 = arith.constant 0 : i32
    %c0_i32_1 = arith.constant 0 : i32
    return %c0_i32, %c0_i32_0 : i32, i32
  }
  func.func @transform_3(%arg0: i32, %arg1: i32) -> (i32, i32) {
    %c0_i32 = arith.constant 0 : i32
    %c0_i32_0 = arith.constant 0 : i32
    %c0_i32_1 = arith.constant 0 : i32
    return %c0_i32, %c0_i32_0 : i32, i32
  }
  func.func @transform_4(%arg0: i32, %arg1: i32) -> (i32, i32) {
    %c0_i32 = arith.constant 0 : i32
    %c0_i32_0 = arith.constant 0 : i32
    return %arg0, %c0_i32 : i32, i32
  }
}

</mosaic_0001>

<bundles_post_ra>
// kernel: image_encoder_wrapper_forward.1
= control target key start
LH: loop header
LB: loop body
LE: loop exit
PB: predicated region body
PF: predicated region fallthrough
CT: control target
= control target key end

     0   :  { %s817_s15 = smov 0   ;;  %s819_s16 = smov 0   ;;  %s928_s0 = inlined_call_operand.vmem [shape: bf16[8,768], index: 0, kind: input, shape index: {}]   ;;  %s929_s1 = inlined_call_operand.vmem [shape: bf16[768,128], index: 1, kind: input, shape index: {}]   ;;  %s930_s2 = inlined_call_operand.vmem [shape: f32[128,128], index: 2, kind: input, shape index: {}]   ;;  %s931_s3 = inlined_call_operand.vmem [shape: f32[1,128], index: 3, kind: input, shape index: {}]   ;;  %s932_s4 = inlined_call_operand.vmem [shape: f32[8,128], index: 4, kind: output, shape index: {}]  }
   0x1   :  { %s821_s17 = smov 0  }
   0x2 LB: > { %s23_s18 = sadd.s32 1, %s783_s16  ;;  %p615_p0 = scmp.ge.s32.totalorder %s787_s17, 1  ;;  %s787_s17 = sphi %s821_s17, %s14_s17   ;;  %s783_s16 = sphi %s819_s16, %s934_s16   ;;  %s779_s15 = sphi %s817_s15, %s933_s15  }
   0x3   : > { %p24_p1 = scmp.ge.s32.totalorder %s23_s18, 3  ;;  %p192_p2 = scmp.lt.s32.totalorder %s787_s17, 4 }
   0x5   : > { %s936_s18 = smov (%p24_p1, %s23_s18), 0  ;;  %p193_p3 = pnand %p615_p0, %p192_p2 }
   0x6   : > { %s616_s19 = sshll.u32 (!%p193_p3), %s779_s15, 1  ;;  %s618_s20 = sshll.u32 (!%p193_p3), %s779_s15, 5 }
   0x7   : > { %196 = sbr.rel (%p193_p3) target bundleno = 614 (0x266), region = 36  ;;  %p229_p4 = scmp.lt.s32.totalorder (!%p193_p3), %s616_s19, 5 }
   0x8   : > { %p237_p5 = scmp.lt.s32.totalorder (!%p193_p3), %s618_s20, 95  ;;  %p620_p6 = scmp.ne.s32.totalorder (!%p193_p3), %s779_s15, 0 }
   0xc   : > { %s938_s19 = smov (!%p229_p4, %s616_s19), 5  ;;  %s940_s20 = smov (!%p237_p5, %s618_s20), 95 }
   0xd   : > { %s617_s21 = sshll.u32 %s938_s19, 2  ;;  %s619_s25 = sshll.u32 %s940_s20, 2 }
   0xe   : > { %s234_s24 = scalar_lea.vmem %s928_s0, %s617_s21  ;;  %s845_s28 = scalar_lea.vmem %s929_s1, %s619_s25 }
   0xf   : > { %250 = sbr.rel (%p620_p6) target bundleno = 22 (0x16), region = 40 }
  0x14   : > { %v789_v0 = vmov 0.0  }
  0x15   : > { %251 = vst [vmem:[#allocation2] sm:$0xff] %v789_v0 }
  0x16 PF: > { %v745_v1 = vld [vmem:[%s845_s28 + $0x78] sm:$0xff]   ;;  %v747_v3 = vld [vmem:[%s845_s28 + $0x70] sm:$0xff]   ;;  %v749_v5 = vld [vmem:[%s845_s28 + $0x68] sm:$0xff]   ;;  %p639_p7 = scmp.ne.s32.totalorder %s779_s15, 2 }
  0x17   : > { %v746_v2 = vld [vmem:[%s845_s28 + $0x38] sm:$0xff]   ;;  %644 = vmatprep.subr.bf16.mxu0 %v745_v1  ;;  %v748_v4 = vld [vmem:[%s845_s28 + $0x30] sm:$0xff]   ;;  %v750_v6 = vld [vmem:[%s845_s28 + $0x28] sm:$0xff]  }
  0x18   : > { %645 = vmatpush3.bf16.msra.mxu0 %v746_v2  ;;  %v751_v7 = vld [vmem:[%s845_s28 + $0x60] sm:$0xff]   ;;  %v753_v9 = vld [vmem:[%s845_s28 + $0x58] sm:$0xff]   ;;  %v755_v11 = vld [vmem:[%s845_s28 + $0x50] sm:$0xff]  }
  0x19   : > { %646 = vmatprep.subr.bf16.mxu0 %v747_v3  ;;  %v752_v8 = vld [vmem:[%s845_s28 + $0x20] sm:$0xff]   ;;  %v754_v10 = vld [vmem:[%s845_s28 + $0x18] sm:$0xff]   ;;  %v756_v14 = vld [vmem:[%s845_s28 + $0x10] sm:$0xff]  }
  0x1a   : > { %v253_v12 = vld [vmem:[%s234_s24] sm:$0xff]  ;;  %v757_v15 = vld [vmem:[%s845_s28 + $0x48] sm:$0xff]  }
  0x1b   : > { %v622_v13 = vcombine.high %v253_v12, %v253_v12  ;;  %v758_v16 = vld [vmem:[%s845_s28 + $0x8] sm:$0xff]   ;;  %v759_v17 = vld [vmem:[%s845_s28 + $0x40] sm:$0xff]   ;;  %v621_v19 = vcombine.low %v253_v12, %v253_v12 }
  0x1c   : > { %647 = vmatpush3.bf16.msra.mxu0 %v748_v4  ;;  %v760_v18 = vld [vmem:[%s845_s28] sm:$0xff]  }
  0x1d   : > { %648 = vmatprep.subr.bf16.mxu0 %v749_v5  ;;  %421 = vmatprep.mubr.bf16.mxu0 %v622_v13  ;;  %v252_v21 = vld [vmem:[#allocation2] sm:$0xff] }
  0x20   : > { %649 = vmatpush3.bf16.msra.mxu0 %v750_v6 }
  0x21   : > { %650 = vmatprep.subr.bf16.mxu0 %v751_v7 }
  0x24   : > { %651 = vmatpush3.bf16.msra.mxu0 %v752_v8 }
  0x25   : > { %652 = vmatprep.subr.bf16.mxu0 %v753_v9 }
  0x28   : > { %653 = vmatpush3.bf16.msra.mxu0 %v754_v10 }
  0x29   : > { %654 = vmatprep.subr.bf16.mxu0 %v755_v11 }
  0x2c   : > { %655 = vmatpush3.bf16.msra.mxu0 %v756_v14 }
  0x2d   : > { %656 = vmatprep.subr.bf16.mxu0 %v757_v15 }
  0x30   : > { %657 = vmatpush3.bf16.msra.mxu0 %v758_v16 }
  0x31   : > { %658 = vmatprep.subr.bf16.mxu0 %v759_v17 }
  0x34   : > { %659 = vmatpush3.bf16.msra.mxu0 %v760_v18 }
  0x37   : > { %422 = vmatmul.mubr.bf16.vlgmr.msra.gmra.mxu0 %v621_v19 }
  0xf7   : > { %v660_v20 = vpop.f32.mrf.mxu0 }
  0xf9   : > { %v661_v22 = vpop.f32.mrf.mxu0 }
  0xfa   : > { %v662_v23 = vadd.f32 %v661_v22, %v660_v20  ;;  %434 = sbr.rel (%p639_p7) target bundleno = 614 (0x266), region = 44 }
  0xfb   : > { %v663_v24 = vpop.f32.mrf.mxu0 }
  0xfc   : > { %v429_v25 = vadd.f32 %v662_v23, %v252_v21 }
  0xfd   : > { %v664_v26 = vpop.f32.mrf.mxu0 }
  0xfe   : > { %430 = vst [vmem:[#allocation2] sm:$0xff] %v429_v25 }
  0xff   : > { %v456_v28 = vld [vmem:[%s930_s2 + $0x78] sm:$0xff]  ;;  %v790_v30 = vmov 0.0   ;;  %v455_v31 = vld [vmem:[%s930_s2 + $0x70] sm:$0xff]  ;;  %v454_v32 = vld [vmem:[%s930_s2 + $0x68] sm:$0xff]  ;;  %vm791_vm0 = vmmov 0  }
 0x100   : > { %683 = vmatprep.subr.mxu0 %v790_v30  ;;  %v453_v33 = vld [vmem:[%s930_s2 + $0x60] sm:$0xff]  ;;  %v452_v34 = vld [vmem:[%s930_s2 + $0x58] sm:$0xff]  ;;  %v451_v35 = vld [vmem:[%s930_s2 + $0x50] sm:$0xff]  ;;  %715 = vmatprep.mubr.msk.f32.mxu0 %vm791_vm0, %v790_v30 }
 0x101   : > { %684 = vmatpush3.msra.mxu0 %v456_v28  ;;  %v450_v36 = vld [vmem:[%s930_s2 + $0x48] sm:$0xff]  ;;  %v449_v37 = vld [vmem:[%s930_s2 + $0x40] sm:$0xff]  ;;  %v448_v38 = vld [vmem:[%s930_s2 + $0x38] sm:$0xff] }
 0x102   : > { %685 = vmatprep.subr.mxu0 %v790_v30  ;;  %v447_v39 = vld [vmem:[%s930_s2 + $0x30] sm:$0xff]  ;;  %v446_v40 = vld [vmem:[%s930_s2 + $0x28] sm:$0xff]  ;;  %v445_v41 = vld [vmem:[%s930_s2 + $0x20] sm:$0xff] }
 0x103   : > { %686 = vmatpush3.msra.mxu0 %v455_v31  ;;  %v444_v42 = vld [vmem:[%s930_s2 + $0x18] sm:$0xff]  ;;  %v443_v43 = vld [vmem:[%s930_s2 + $0x10] sm:$0xff]  ;;  %v442_v44 = vld [vmem:[%s930_s2 + $0x8] sm:$0xff] }
 0x104   : > { %687 = vmatprep.subr.mxu0 %v790_v30  ;;  %v441_v45 = vld [vmem:[%s930_s2] sm:$0xff] }
 0x105   : > { %v435_v27 = vld [vmem:[#allocation2] sm:$0xff]  ;;  %688 = vmatpush3.msra.mxu0 %v454_v32 }
 0x106   : > { %v436_v29 = vmul.f32 %v435_v27, %v435_v27  ;;  %689 = vmatprep.subr.mxu0 %v790_v30  ;;  %v640_v49 = vld [vmem:[%s931_s3] ss:$0 sm:$0xff] }
 0x107   : > { %690 = vmatpush3.msra.mxu0 %v453_v33 }
 0x108   : > { %437 = vadd.xlane.f32.xlu0 %v436_v29  ;;  %691 = vmatprep.subr.mxu0 %v790_v30 }
 0x109   : > { %692 = vmatpush3.msra.mxu0 %v452_v34 }
 0x10a   : > { %693 = vmatprep.subr.mxu0 %v790_v30 }
 0x10b   : > { %694 = vmatpush3.msra.mxu0 %v451_v35 }
 0x10c   : > { %695 = vmatprep.subr.mxu0 %v790_v30 }
 0x10d   : > { %696 = vmatpush3.msra.mxu0 %v450_v36 }
 0x10e   : > { %697 = vmatprep.subr.mxu0 %v790_v30 }
 0x10f   : > { %698 = vmatpush3.msra.mxu0 %v449_v37 }
 0x110   : > { %699 = vmatprep.subr.mxu0 %v790_v30 }
 0x111   : > { %700 = vmatpush3.msra.mxu0 %v448_v38 }
 0x112   : > { %701 = vmatprep.subr.mxu0 %v790_v30 }
 0x113   : > { %702 = vmatpush3.msra.mxu0 %v447_v39 }
 0x114   : > { %703 = vmatprep.subr.mxu0 %v790_v30 }
 0x115   : > { %704 = vmatpush3.msra.mxu0 %v446_v40 }
 0x116   : > { %705 = vmatprep.subr.mxu0 %v790_v30 }
 0x117   : > { %706 = vmatpush3.msra.mxu0 %v445_v41 }
 0x118   : > { %707 = vmatprep.subr.mxu0 %v790_v30 }
 0x119   : > { %708 = vmatpush3.msra.mxu0 %v444_v42 }
 0x11a   : > { %709 = vmatprep.subr.mxu0 %v790_v30 }
 0x11b   : > { %710 = vmatpush3.msra.mxu0 %v443_v43 }
 0x11c   : > { %711 = vmatprep.subr.mxu0 %v790_v30 }
 0x11d   : > { %712 = vmatpush3.msra.mxu0 %v442_v44 }
 0x11e   : > { %713 = vmatprep.subr.mxu0 %v790_v30 }
 0x11f   : > { %714 = vmatpush3.msra.mxu0 %v441_v45 }
 0x191   : > { %v438_v46 = vpop.xlane.xlu0 %437 }
 0x192   : > { %763 = vrsqrt.f32 %v438_v46 }
 0x19f   : > { %v764_v47 = vpop.eup %763 }
 0x1a0   : > { %v440_v48 = vmul.f32 %v764_v47, %v435_v27 }
 0x1a2   : > { %716 = vmatmul.mubr.f32.vlgmr.msra.gmra.mxu0 %v440_v48 }
 0x262   : > { %v530_v50 = vpop.f32.mrf.mxu0 }
 0x263   : > { %v531_v51 = vadd.f32 %v640_v49, %v530_v50 }
 0x264   : > { %v717_v52 = vpop.f32.mrf.mxu0 }
 0x265   : > { %534 = vst [vmem:[%s932_s4] sm:$0xff] %v531_v51 }
 0x266 PF: > { %s14_s17 = sadd.s32 1, %s787_s17   ;;  %s933_s15 = smov %s783_s16 }
 0x267   : > { %p11_p8 = scmp.ge.s32.totalorder %s14_s17, 5   ;;  %s934_s16 = smov %s936_s18 }
 0x269   :  { %13 = sbr.rel (!%p11_p8) target bundleno = 2 (0x2), region = 77 }

</bundles_post_ra>
